<compile_context>
chip_gen: v6e
topology: v6e:2x2x1
jax: 0.10.0
libtpu: 0.0.40
codegen_flags: <defaults>
</compile_context>

<pallas_src>
import functools

import jax
import jax.numpy as jnp
from jax.experimental import pallas as pl
from jax.experimental.pallas import tpu as pltpu


def _round_up(x, m):
    return ((x + m - 1) // m) * m


# ------------------------- Pallas kernel -------------------------

def decoder_e_kernel(x_ref, w0, b0, w1, b1, w2, b2, w3, b3, wo, bo, out_ref):
    """Fused Decoder_E forward on one batch tile."""

    def dense(h, w_ref, b_ref):
        # bf16 MXU inputs, f32 accumulate; bias/activations stay f32.
        return jnp.dot(h.astype(jnp.bfloat16),
                       w_ref[...].astype(jnp.bfloat16),
                       preferred_element_type=jnp.float32) + b_ref[...]

    h = dense(x_ref[...], w0, b0)                        # fc0 (no activation)
    h = jnp.maximum(dense(h, w1, b1), 0.0)               # relu(fc1)
    h = jnp.maximum(dense(h, w2, b2), 0.0)               # relu(fc2)
    h = jnp.maximum(dense(h, w3, b3), 0.0)               # relu(fc3)
    out_ref[...] = jnp.maximum(dense(h, wo, bo), 0.0)    # relu(Xout)


# ------------------------- wrapper -------------------------

@functools.partial(jax.jit, static_argnames=("block_n",))
def decoder_e_forward(x, params, *, block_n=128):
    n, in_dim = x.shape
    out_dim = params["wo"].shape[1]

    # Tile the batch (sublane) axis; cap the tile at the (8-padded) batch.
    blk = min(block_n, max(8, _round_up(n, 8)))
    n_pad = _round_up(n, blk)
    if n_pad != n:
        x = jnp.pad(x, ((0, n_pad - n), (0, 0)))

    weight_args = (params["w0"], params["b0"], params["w1"], params["b1"],
                   params["w2"], params["b2"], params["w3"], params["b3"],
                   params["wo"], params["bo"])

    out = pl.pallas_call(
        decoder_e_kernel,
        out_shape=jax.ShapeDtypeStruct((n_pad, out_dim), jnp.float32),
        grid=(n_pad // blk,),
        in_specs=[pl.BlockSpec((blk, in_dim), lambda i: (i, 0))]
                 + [pl.BlockSpec(a.shape, lambda i: (0, 0)) for a in weight_args],
        out_specs=pl.BlockSpec((blk, out_dim), lambda i: (i, 0)),
        compiler_params=pltpu.CompilerParams(
            # batch tiles are independent -> shard across TCs on v7x
            dimension_semantics=("parallel",)),
    )(x, *weight_args)
    return out[:n]


# ------------------------- deterministic parameter init -------------------------

def init_linear(key, in_dim, out_dim):
    # PyTorch nn.Linear default: U(-1/sqrt(fan_in), 1/sqrt(fan_in)).
    kw, kb = jax.random.split(key)
    bound = 1.0 / (in_dim ** 0.5)
    # stored transposed vs PyTorch: weight (in_dim, out_dim), y = x @ W + b
    w = jax.random.uniform(kw, (in_dim, out_dim), jnp.float32, -bound, bound)
    b = jax.random.uniform(kb, (1, out_dim), jnp.float32, -bound, bound)
    return w, b


# ------------------------- main -------------------------

if __name__ == "__main__":
    N = 16
    in_dim, int_dim, out_dim = 3, 50, 1000   # Decoder_E defaults

    root = jax.random.PRNGKey(0)
    kx, k0, k1, k2, k3, ko = jax.random.split(root, 6)
    x = jax.random.normal(kx, (N, in_dim), jnp.float32)

    params = {}
    params["w0"], params["b0"] = init_linear(k0, in_dim, int_dim)
    params["w1"], params["b1"] = init_linear(k1, int_dim, int_dim)
    params["w2"], params["b2"] = init_linear(k2, int_dim, int_dim)
    params["w3"], params["b3"] = init_linear(k3, int_dim, int_dim)
    params["wo"], params["bo"] = init_linear(ko, int_dim, out_dim)

    y = decoder_e_forward(x, params)
    jax.block_until_ready(y)

    # plain-JAX reference using the same bf16-input / f32-accumulate convention
    def ref(x, p):
        def dense(h, w, b):
            return jnp.dot(h.astype(jnp.bfloat16), w.astype(jnp.bfloat16),
                           preferred_element_type=jnp.float32) + b
        h = dense(x, p["w0"], p["b0"])
        h = jax.nn.relu(dense(h, p["w1"], p["b1"]))
        h = jax.nn.relu(dense(h, p["w2"], p["b2"]))
        h = jax.nn.relu(dense(h, p["w3"], p["b3"]))
        return jax.nn.relu(dense(h, p["wo"], p["bo"]))

    y_ref = ref(x, params)

    assert y.shape == (N, out_dim)
    assert bool(jnp.isfinite(y).all())
    assert bool(jnp.allclose(y, y_ref, rtol=2e-2, atol=2e-2))

    print("KERNEL_OK")
</pallas_src>

<mosaic_0001>
module attributes {stable_mosaic.version = 11 : i64} {
  func.func @decoder_e_kernel(%arg0: i32, %arg1: memref<16x3xf32, #tpu.memory_space<vmem>>, %arg2: memref<3x50xf32, #tpu.memory_space<vmem>>, %arg3: memref<1x50xf32, #tpu.memory_space<vmem>>, %arg4: memref<50x50xf32, #tpu.memory_space<vmem>>, %arg5: memref<1x50xf32, #tpu.memory_space<vmem>>, %arg6: memref<50x50xf32, #tpu.memory_space<vmem>>, %arg7: memref<1x50xf32, #tpu.memory_space<vmem>>, %arg8: memref<50x50xf32, #tpu.memory_space<vmem>>, %arg9: memref<1x50xf32, #tpu.memory_space<vmem>>, %arg10: memref<50x1000xf32, #tpu.memory_space<vmem>>, %arg11: memref<1x1000xf32, #tpu.memory_space<vmem>>, %arg12: memref<16x1000xf32, #tpu.memory_space<vmem>>) attributes {dimension_semantics = [#tpu.dimension_semantics<parallel>], iteration_bounds = array<i64: 1>, scalar_prefetch = 0 : i64, scratch_operands = 0 : i64, tpu.core_type = #tpu.core_type<tc>, window_params = [{transform_indices = @transform_0, window_bounds = array<i64: 16, 3>}, {pipeline_mode = #tpu.pipeline_mode<synchronous>, transform_indices = @transform_1, window_bounds = array<i64: 3, 50>}, {pipeline_mode = #tpu.pipeline_mode<synchronous>, transform_indices = @transform_2, window_bounds = array<i64: 1, 50>}, {pipeline_mode = #tpu.pipeline_mode<synchronous>, transform_indices = @transform_3, window_bounds = array<i64: 50, 50>}, {pipeline_mode = #tpu.pipeline_mode<synchronous>, transform_indices = @transform_4, window_bounds = array<i64: 1, 50>}, {pipeline_mode = #tpu.pipeline_mode<synchronous>, transform_indices = @transform_5, window_bounds = array<i64: 50, 50>}, {pipeline_mode = #tpu.pipeline_mode<synchronous>, transform_indices = @transform_6, window_bounds = array<i64: 1, 50>}, {pipeline_mode = #tpu.pipeline_mode<synchronous>, transform_indices = @transform_7, window_bounds = array<i64: 50, 50>}, {pipeline_mode = #tpu.pipeline_mode<synchronous>, transform_indices = @transform_8, window_bounds = array<i64: 1, 50>}, {pipeline_mode = #tpu.pipeline_mode<synchronous>, transform_indices = @transform_9, window_bounds = array<i64: 50, 1000>}, {pipeline_mode = #tpu.pipeline_mode<synchronous>, transform_indices = @transform_10, window_bounds = array<i64: 1, 1000>}, {transform_indices = @transform_11, window_bounds = array<i64: 16, 1000>}]} {
    %c0 = arith.constant 0 : index
    %c0_0 = arith.constant 0 : index
    %0 = vector.load %arg1[%c0, %c0_0] : memref<16x3xf32, #tpu.memory_space<vmem>>, vector<16x3xf32>
    %1 = arith.truncf %0 : vector<16x3xf32> to vector<16x3xbf16>
    %c0_1 = arith.constant 0 : index
    %c0_2 = arith.constant 0 : index
    %2 = vector.load %arg2[%c0_1, %c0_2] : memref<3x50xf32, #tpu.memory_space<vmem>>, vector<3x50xf32>
    %3 = arith.truncf %2 : vector<3x50xf32> to vector<3x50xbf16>
    %cst = arith.constant dense<0.000000e+00> : vector<16x50xf32>
    %4 = tpu.matmul %1, %3, %cst {dimension_numbers = #tpu.dot_dimension_numbers<[1], [0], [0], [1], [0, 0, 1, 1], [], []>} : vector<16x3xbf16>, vector<3x50xbf16>, vector<16x50xf32> -> vector<16x50xf32>
    %c0_3 = arith.constant 0 : index
    %c0_4 = arith.constant 0 : index
    %5 = vector.load %arg3[%c0_3, %c0_4] : memref<1x50xf32, #tpu.memory_space<vmem>>, vector<1x50xf32>
    %6 = vector.broadcast %5 : vector<1x50xf32> to vector<16x50xf32>
    %7 = arith.addf %4, %6 : vector<16x50xf32>
    %8 = arith.truncf %7 : vector<16x50xf32> to vector<16x50xbf16>
    %c0_5 = arith.constant 0 : index
    %c0_6 = arith.constant 0 : index
    %9 = vector.load %arg4[%c0_5, %c0_6] : memref<50x50xf32, #tpu.memory_space<vmem>>, vector<50x50xf32>
    %10 = arith.truncf %9 : vector<50x50xf32> to vector<50x50xbf16>
    %cst_7 = arith.constant dense<0.000000e+00> : vector<16x50xf32>
    %11 = tpu.matmul %8, %10, %cst_7 {dimension_numbers = #tpu.dot_dimension_numbers<[1], [0], [0], [1], [0, 0, 1, 1], [], []>} : vector<16x50xbf16>, vector<50x50xbf16>, vector<16x50xf32> -> vector<16x50xf32>
    %c0_8 = arith.constant 0 : index
    %c0_9 = arith.constant 0 : index
    %12 = vector.load %arg5[%c0_8, %c0_9] : memref<1x50xf32, #tpu.memory_space<vmem>>, vector<1x50xf32>
    %13 = vector.broadcast %12 : vector<1x50xf32> to vector<16x50xf32>
    %14 = arith.addf %11, %13 : vector<16x50xf32>
    %cst_10 = arith.constant 0.000000e+00 : f32
    %15 = vector.broadcast %cst_10 : f32 to vector<16x50xf32>
    %16 = arith.maximumf %14, %15 : vector<16x50xf32>
    %17 = arith.truncf %16 : vector<16x50xf32> to vector<16x50xbf16>
    %c0_11 = arith.constant 0 : index
    %c0_12 = arith.constant 0 : index
    %18 = vector.load %arg6[%c0_11, %c0_12] : memref<50x50xf32, #tpu.memory_space<vmem>>, vector<50x50xf32>
    %19 = arith.truncf %18 : vector<50x50xf32> to vector<50x50xbf16>
    %cst_13 = arith.constant dense<0.000000e+00> : vector<16x50xf32>
    %20 = tpu.matmul %17, %19, %cst_13 {dimension_numbers = #tpu.dot_dimension_numbers<[1], [0], [0], [1], [0, 0, 1, 1], [], []>} : vector<16x50xbf16>, vector<50x50xbf16>, vector<16x50xf32> -> vector<16x50xf32>
    %c0_14 = arith.constant 0 : index
    %c0_15 = arith.constant 0 : index
    %21 = vector.load %arg7[%c0_14, %c0_15] : memref<1x50xf32, #tpu.memory_space<vmem>>, vector<1x50xf32>
    %22 = vector.broadcast %21 : vector<1x50xf32> to vector<16x50xf32>
    %23 = arith.addf %20, %22 : vector<16x50xf32>
    %cst_16 = arith.constant 0.000000e+00 : f32
    %24 = vector.broadcast %cst_16 : f32 to vector<16x50xf32>
    %25 = arith.maximumf %23, %24 : vector<16x50xf32>
    %26 = arith.truncf %25 : vector<16x50xf32> to vector<16x50xbf16>
    %c0_17 = arith.constant 0 : index
    %c0_18 = arith.constant 0 : index
    %27 = vector.load %arg8[%c0_17, %c0_18] : memref<50x50xf32, #tpu.memory_space<vmem>>, vector<50x50xf32>
    %28 = arith.truncf %27 : vector<50x50xf32> to vector<50x50xbf16>
    %cst_19 = arith.constant dense<0.000000e+00> : vector<16x50xf32>
    %29 = tpu.matmul %26, %28, %cst_19 {dimension_numbers = #tpu.dot_dimension_numbers<[1], [0], [0], [1], [0, 0, 1, 1], [], []>} : vector<16x50xbf16>, vector<50x50xbf16>, vector<16x50xf32> -> vector<16x50xf32>
    %c0_20 = arith.constant 0 : index
    %c0_21 = arith.constant 0 : index
    %30 = vector.load %arg9[%c0_20, %c0_21] : memref<1x50xf32, #tpu.memory_space<vmem>>, vector<1x50xf32>
    %31 = vector.broadcast %30 : vector<1x50xf32> to vector<16x50xf32>
    %32 = arith.addf %29, %31 : vector<16x50xf32>
    %cst_22 = arith.constant 0.000000e+00 : f32
    %33 = vector.broadcast %cst_22 : f32 to vector<16x50xf32>
    %34 = arith.maximumf %32, %33 : vector<16x50xf32>
    %35 = arith.truncf %34 : vector<16x50xf32> to vector<16x50xbf16>
    %c0_23 = arith.constant 0 : index
    %c0_24 = arith.constant 0 : index
    %36 = vector.load %arg10[%c0_23, %c0_24] : memref<50x1000xf32, #tpu.memory_space<vmem>>, vector<50x1000xf32>
    %37 = arith.truncf %36 : vector<50x1000xf32> to vector<50x1000xbf16>
    %cst_25 = arith.constant dense<0.000000e+00> : vector<16x1000xf32>
    %38 = tpu.matmul %35, %37, %cst_25 {dimension_numbers = #tpu.dot_dimension_numbers<[1], [0], [0], [1], [0, 0, 1, 1], [], []>} : vector<16x50xbf16>, vector<50x1000xbf16>, vector<16x1000xf32> -> vector<16x1000xf32>
    %c0_26 = arith.constant 0 : index
    %c0_27 = arith.constant 0 : index
    %39 = vector.load %arg11[%c0_26, %c0_27] : memref<1x1000xf32, #tpu.memory_space<vmem>>, vector<1x1000xf32>
    %40 = vector.broadcast %39 : vector<1x1000xf32> to vector<16x1000xf32>
    %41 = arith.addf %38, %40 : vector<16x1000xf32>
    %cst_28 = arith.constant 0.000000e+00 : f32
    %42 = vector.broadcast %cst_28 : f32 to vector<16x1000xf32>
    %43 = arith.maximumf %41, %42 : vector<16x1000xf32>
    %c0_29 = arith.constant 0 : index
    %c0_30 = arith.constant 0 : index
    %44 = vector.load %arg12[%c0_29, %c0_30] : memref<16x1000xf32, #tpu.memory_space<vmem>>, vector<16x1000xf32>
    tpu.vector_store %arg12[%c0_29, %c0_30], %43 {strides = array<i32>} : memref<16x1000xf32, #tpu.memory_space<vmem>>, vector<16x1000xf32>,
    return
  }
  func.func @transform_0(%arg0: i32) -> (i32, i32) {
    %c0_i32 = arith.constant 0 : i32
    %c0_i32_0 = arith.constant 0 : i32
    return %arg0, %c0_i32 : i32, i32
  }
  func.func @transform_1(%arg0: i32) -> (i32, i32) {
    %c0_i32 = arith.constant 0 : i32
    %c0_i32_0 = arith.constant 0 : i32
    %c0_i32_1 = arith.constant 0 : i32
    return %c0_i32, %c0_i32_0 : i32, i32
  }
  func.func @transform_2(%arg0: i32) -> (i32, i32) {
    %c0_i32 = arith.constant 0 : i32
    %c0_i32_0 = arith.constant 0 : i32
    %c0_i32_1 = arith.constant 0 : i32
    return %c0_i32, %c0_i32_0 : i32, i32
  }
  func.func @transform_3(%arg0: i32) -> (i32, i32) {
    %c0_i32 = arith.constant 0 : i32
    %c0_i32_0 = arith.constant 0 : i32
    %c0_i32_1 = arith.constant 0 : i32
    return %c0_i32, %c0_i32_0 : i32, i32
  }
  func.func @transform_4(%arg0: i32) -> (i32, i32) {
    %c0_i32 = arith.constant 0 : i32
    %c0_i32_0 = arith.constant 0 : i32
    %c0_i32_1 = arith.constant 0 : i32
    return %c0_i32, %c0_i32_0 : i32, i32
  }
  func.func @transform_5(%arg0: i32) -> (i32, i32) {
    %c0_i32 = arith.constant 0 : i32
    %c0_i32_0 = arith.constant 0 : i32
    %c0_i32_1 = arith.constant 0 : i32
    return %c0_i32, %c0_i32_0 : i32, i32
  }
  func.func @transform_6(%arg0: i32) -> (i32, i32) {
    %c0_i32 = arith.constant 0 : i32
    %c0_i32_0 = arith.constant 0 : i32
    %c0_i32_1 = arith.constant 0 : i32
    return %c0_i32, %c0_i32_0 : i32, i32
  }
  func.func @transform_7(%arg0: i32) -> (i32, i32) {
    %c0_i32 = arith.constant 0 : i32
    %c0_i32_0 = arith.constant 0 : i32
    %c0_i32_1 = arith.constant 0 : i32
    return %c0_i32, %c0_i32_0 : i32, i32
  }
  func.func @transform_8(%arg0: i32) -> (i32, i32) {
    %c0_i32 = arith.constant 0 : i32
    %c0_i32_0 = arith.constant 0 : i32
    %c0_i32_1 = arith.constant 0 : i32
    return %c0_i32, %c0_i32_0 : i32, i32
  }
  func.func @transform_9(%arg0: i32) -> (i32, i32) {
    %c0_i32 = arith.constant 0 : i32
    %c0_i32_0 = arith.constant 0 : i32
    %c0_i32_1 = arith.constant 0 : i32
    return %c0_i32, %c0_i32_0 : i32, i32
  }
  func.func @transform_10(%arg0: i32) -> (i32, i32) {
    %c0_i32 = arith.constant 0 : i32
    %c0_i32_0 = arith.constant 0 : i32
    %c0_i32_1 = arith.constant 0 : i32
    return %c0_i32, %c0_i32_0 : i32, i32
  }
  func.func @transform_11(%arg0: i32) -> (i32, i32) {
    %c0_i32 = arith.constant 0 : i32
    %c0_i32_0 = arith.constant 0 : i32
    return %arg0, %c0_i32 : i32, i32
  }
}

</mosaic_0001>

<bundles_post_ra>
// kernel: decoder_e_forward.1
= control target key start
LH: loop header
LB: loop body
LE: loop exit
PB: predicated region body
PF: predicated region fallthrough
CT: control target
= control target key end

     0   :  { %16 = vsyncpa [#allocation3], 0  ;;  %s1102_s0 = inlined_call_operand.vmem [shape: f32[16,3], index: 0, kind: input, shape index: {}]   ;;  %s1103_s1 = inlined_call_operand.vmem [shape: f32[3,50], index: 1, kind: input, shape index: {}]   ;;  %s1104_s2 = inlined_call_operand.vmem [shape: f32[1,50], index: 2, kind: input, shape index: {}]   ;;  %s1105_s3 = inlined_call_operand.hbm [shape: f32[50,50], index: 3, kind: input, shape index: {}]   ;;  %s1106_s4 = inlined_call_operand.vmem [shape: f32[1,50], index: 4, kind: input, shape index: {}]   ;;  %s1107_s5 = inlined_call_operand.hbm [shape: f32[50,50], index: 5, kind: input, shape index: {}]   ;;  %s1108_s6 = inlined_call_operand.vmem [shape: f32[1,50], index: 6, kind: input, shape index: {}]   ;;  %s1109_s7 = inlined_call_operand.hbm [shape: f32[50,50], index: 7, kind: input, shape index: {}]   ;;  %s1110_s8 = inlined_call_operand.vmem [shape: f32[1,50], index: 8, kind: input, shape index: {}]   ;;  %s1111_s9 = inlined_call_operand.hbm [shape: f32[50,1000], index: 9, kind: input, shape index: {}]   ;;  %s1112_s10 = inlined_call_operand.vmem [shape: f32[1,1000], index: 10, kind: input, shape index: {}]   ;;  %s1113_s11 = inlined_call_operand.hbm [shape: f32[16,1000], index: 11, kind: output, shape index: {}]  }
   0x1   :  { %17 = vsyncpa [#allocation6], 0 }
   0x2   :  { %18 = vsyncpa [#allocation9], 0 }
   0x3   :  { %19 = vsyncpa [#allocation4], 0  ;;  %s942_s17 = smov [#allocation5]   ;;  %s943_s19 = smov [#allocation2]  }
   0x4   :  { %s45_s18 = sshll.u32 %s942_s17, 4  ;;  %s31_s20 = sshll.u32 %s943_s19, 4  ;;  %s46_s18 = int_to_ptr.vmem [resolvable:$true] %s45_s18  ;;  %s32_s20 = int_to_ptr.vmem [resolvable:$true] %s31_s20 }
   0x5   :  { %s842_s21 = scalar_lea.vmem %s46_s18, 896  ;;  %p847_p1 = scmp.lt.s32.totalorder %s46_s18, %s46_s18 }
   0x6   :  { %p843_p0 = scmp.ne.s32.totalorder %s46_s18, %s842_s21  ;;  %p848_p2 = scmp.lt.s32.totalorder %s842_s21, %s842_s21 }
   0x8   :  { %p849_p3 = por %p848_p2, %p847_p1 }
   0xa   :  { %p850_p4 = pnand %p849_p3, %p843_p0 }
   0xc   :  { %853 = shalt.err (!%p850_p4)
}
   0xd   :  { %s944_s22 = smov 128   ;;  %s945_s23 = smov 8  }
   0xe   :  { %51 = dma.hbm_to_vmem [thread:$0]  %s1107_s5, 896, %s46_s18, [#allocation6], %s944_s22, %s944_s22, %s945_s23  }
   0xf   :  { %s862_s26 = scalar_lea.vmem %s32_s20, 896  ;;  %p867_p6 = scmp.lt.s32.totalorder %s32_s20, %s32_s20 }
  0x10   :  { %p863_p5 = scmp.ne.s32.totalorder %s32_s20, %s862_s26  ;;  %p868_p7 = scmp.lt.s32.totalorder %s862_s26, %s862_s26 }
  0x12   :  { %p869_p8 = por %p868_p7, %p867_p6 }
  0x14   :  { %p870_p9 = pnand %p869_p8, %p863_p5 }
  0x16   :  { %873 = shalt.err (!%p870_p9)
}
  0x17   :  { %37 = dma.hbm_to_vmem [thread:$0]  %s1105_s3, 896, %s32_s20, [#allocation3], %s944_s22, %s944_s22, %s945_s23  }
  0x18   :  { %s946_s29 = smov [#allocation7]   ;;  %s947_s12 = smov [#allocation8]  }
  0x19   :  { %s59_s30 = sshll.u32 %s946_s29, 4  ;;  %s73_s13 = sshll.u32 %s947_s12, 4  ;;  %s60_s30 = int_to_ptr.vmem [resolvable:$true] %s59_s30  ;;  %s74_s13 = int_to_ptr.vmem [resolvable:$true] %s73_s13 }
  0x1a   :  { %s882_s14 = scalar_lea.vmem %s60_s30, 896  ;;  %p887_p11 = scmp.lt.s32.totalorder %s60_s30, %s60_s30 }
  0x1b   :  { %p883_p10 = scmp.ne.s32.totalorder %s60_s30, %s882_s14  ;;  %p888_p12 = scmp.lt.s32.totalorder %s882_s14, %s882_s14 }
  0x1d   :  { %p889_p13 = por %p888_p12, %p887_p11 }
  0x1f   :  { %p890_p0 = pnand %p889_p13, %p883_p10 }
  0x21   :  { %893 = shalt.err (!%p890_p0)
}
  0x22   :  { %65 = dma.hbm_to_vmem [thread:$0]  %s1109_s7, 896, %s60_s30, [#allocation6], %s944_s22, %s944_s22, %s945_s23  }
  0x23   :  { %s902_s16 = scalar_lea.vmem %s74_s13, 7168  ;;  %p907_p2 = scmp.lt.s32.totalorder %s74_s13, %s74_s13 }
  0x24   :  { %p903_p1 = scmp.ne.s32.totalorder %s74_s13, %s902_s16  ;;  %p908_p3 = scmp.lt.s32.totalorder %s902_s16, %s902_s16 }
  0x26   :  { %p909_p4 = por %p908_p3, %p907_p2 }
  0x28   :  { %p910_p5 = pnand %p909_p4, %p903_p1 }
  0x2a   :  { %913 = shalt.err (!%p910_p5)
}
  0x2b   :  { %s948_s3 = smov 1024   ;;  %s949_s17 = smov 64  }
  0x2c   :  { %79 = dma.hbm_to_vmem [thread:$0]  %s1111_s9, 7168, %s74_s13, [#allocation9], %s948_s3, %s948_s3, %s949_s17  }
  0x2d   :  { %934 = dma.done.wait [#allocation3], 896  }
  0x2e   :  { %935 = vsyncadd [#allocation3], 4294966400 }
  0x2f   :  { %936 = dma.done.wait [#allocation6], 1792  }
  0x30   :  { %937 = vsyncadd [#allocation6], 4294965504 }
  0x31   :  { %938 = dma.done.wait [#allocation9], 7168  }
  0x32   :  { %939 = vsyncadd [#allocation9], 4294960128  ;;  %v950_v0 = vmov 0.0   ;;  %vm111_vm0 = vcmask 1040384   ;;  %vm951_vm1 = vmmov 0   ;;  %vm112_vm2 = vcmask 1041408  }
  0x33   :  { %779 = vmatprep.subr.bf16.mxu0 %v950_v0  ;;  %785 = vmatprep.subr.bf16.mxu1 %v950_v0  ;;  %v952_v1 = vmov 65535   ;;  %v98_v3 = vld [vmem:[%s1103_s1] sm:$0x7]  ;;  %v96_v7 = vld [vmem:[%s1102_s0 + $0x8] sm:$0xff]  ;;  %v166_v8 = vld [vmem:[#allocation2 + $0x30] sm:$0x3] }
  0x34   :  { %781 = vmatprep.mubr.msk.bf16.mxu0 %vm951_vm1, %v950_v0  ;;  %793 = vmatprep.mubr.msk.bf16.mxu1 %vm951_vm1, %v950_v0  ;;  %v113_v2 = vsel %vm111_vm0, 4294967295, %v952_v1  ;;  %v99_v5 = vpack.c.bf16 %v98_v3, %v98_v3  ;;  %v95_v6 = vld [vmem:[%s1102_s0] sm:$0xff]  ;;  %v170_v9 = vpack.c.bf16 %v166_v8, %v166_v8  ;;  %v165_v11 = vld [vmem:[#allocation2 + $0x28] sm:$0xff]  ;;  %vm107_vm3 = vcmask 23552   ;;  %v162_v16 = vld [vmem:[#allocation2 + $0x10] sm:$0xff] }
  0x35   :  { %v114_v4 = vsel %vm112_vm2, %v113_v2, 0  ;;  %v164_v10 = vld [vmem:[#allocation2 + $0x20] sm:$0xff]  ;;  %v97_v13 = vpack.c.bf16 %v96_v7, %v95_v6  ;;  %v163_v17 = vld [vmem:[#allocation2 + $0x18] sm:$0xff]  ;;  %v161_v20 = vld [vmem:[#allocation2 + $0x8] sm:$0xff]  ;;  %vm178_vm4 = vcmask 408576   ;;  %vm717_vm5 = vcmask 850944  }
  0x36   :  { %v116_v12 = vand.u32 %v114_v4, %v99_v5  ;;  %v183_v14 = vsel %vm111_vm0, %v170_v9, 0  ;;  %v169_v15 = vpack.c.bf16 %v165_v11, %v164_v10  ;;  %v168_v18 = vpack.c.bf16 %v163_v17, %v162_v16  ;;  %v160_v19 = vld [vmem:[#allocation2] sm:$0xff]  ;;  %v235_v22 = vld [vmem:[#allocation5 + $0x30] sm:$0x3]  ;;  %v233_v33 = vld [vmem:[#allocation5 + $0x20] sm:$0xff] }
  0x37   :  { %786 = vmatpush3.bf16.msra.mxu1 %v183_v14  ;;  %v167_v21 = vpack.c.bf16 %v161_v20, %v160_v19  ;;  %v239_v23 = vpack.c.bf16 %v235_v22, %v235_v22  ;;  %v746_v26 = vld [vmem:[%s1104_s2] ss:$0 sm:$0xff]  ;;  %v231_v36 = vld [vmem:[#allocation5 + $0x10] sm:$0xff]  ;;  %v232_v37 = vld [vmem:[#allocation5 + $0x18] sm:$0xff] }
  0x38   :  { %780 = vmatpush3.bf16.msra.mxu0 %v116_v12  ;;  %787 = vmatprep.subr.bf16.mxu1 %v950_v0  ;;  %v234_v34 = vld [vmem:[#allocation5 + $0x28] sm:$0xff]  ;;  %v237_v38 = vpack.c.bf16 %v232_v37, %v231_v36  ;;  %v229_v39 = vld [vmem:[#allocation5] sm:$0xff]  ;;  %v301_v55 = vld [vmem:[#allocation7 + $0x20] sm:$0xff] }
  0x39   :  { %797 = vmatprep.subr.bf16.mxu0 %v950_v0  ;;  %v251_v24 = vsel %vm111_vm0, %v239_v23, 0  ;;  %v238_v35 = vpack.c.bf16 %v234_v34, %v233_v33  ;;  %v230_v40 = vld [vmem:[#allocation5 + $0x8] sm:$0xff]  ;;  %v302_v56 = vld [vmem:[#allocation7 + $0x28] sm:$0xff]  ;;  %v300_v59 = vld [vmem:[#allocation7 + $0x18] sm:$0xff] }
  0x3a   :  { %v236_v41 = vpack.c.bf16 %v230_v40, %v229_v39  ;;  %v303_v42 = vld [vmem:[#allocation7 + $0x30] sm:$0x3]  ;;  %v306_v57 = vpack.c.bf16 %v302_v56, %v301_v55  ;;  %v297_v61 = vld [vmem:[#allocation7] sm:$0xff]  ;;  %v298_v62 = vld [vmem:[#allocation7 + $0x8] sm:$0xff] }
  0x3b   :  { %782 = vmatmul.mubr.msk.bf16.vlgmr.msra.gmra.mxu0 %vm107_vm3, %v97_v13  ;;  %788 = vmatpush3.bf16.msra.mxu1 %v169_v15  ;;  %v307_v43 = vpack.c.bf16 %v303_v42, %v303_v42  ;;  %v748_v45 = vld [vmem:[%s1106_s4] ss:$0 sm:$0xff]  ;;  %v304_v63 = vpack.c.bf16 %v298_v62, %v297_v61  ;;  %v414_v1 = vld [vmem:[#allocation8 + $0x188] sm:$0x3]  ;;  %v413_v3 = vld [vmem:[#allocation8 + $0x180] sm:$0x3] }
  0x3c   :  { %805 = vmatprep.mubr.msk.bf16.mxu0 %vm951_vm1, %v950_v0  ;;  %789 = vmatprep.subr.bf16.mxu1 %v950_v0  ;;  %v299_v58 = vld [vmem:[#allocation7 + $0x10] sm:$0xff]  ;;  %v446_v4 = vpack.c.bf16 %v414_v1, %v414_v1  ;;  %v445_v6 = vpack.c.bf16 %v413_v3, %v413_v3  ;;  %v398_v7 = vld [vmem:[#allocation8 + $0x108] sm:$0xff]  ;;  %v397_v10 = vld [vmem:[#allocation8 + $0x100] sm:$0xff] }
  0x3d   :  { %798 = vmatpush3.bf16.msra.mxu0 %v251_v24  ;;  %v319_v44 = vsel %vm111_vm0, %v307_v43, 0  ;;  %v305_v60 = vpack.c.bf16 %v300_v59, %v299_v58  ;;  %v416_v2 = vld [vmem:[#allocation8 + $0x198] sm:$0x3]  ;;  %v406_v8 = vld [vmem:[#allocation8 + $0x148] sm:$0xff]  ;;  %v405_v11 = vld [vmem:[#allocation8 + $0x140] sm:$0xff] }
  0x3e   :  { %799 = vmatprep.subr.bf16.mxu0 %v950_v0  ;;  %v448_v5 = vpack.c.bf16 %v416_v2, %v416_v2  ;;  %v438_v9 = vpack.c.bf16 %v406_v8, %v398_v7  ;;  %v437_v12 = vpack.c.bf16 %v405_v11, %v397_v10  ;;  %v750_v13 = vld [vmem:[%s1108_s6] ss:$0 sm:$0xff]  ;;  %v415_v16 = vld [vmem:[#allocation8 + $0x190] sm:$0x3]  ;;  %v390_v33 = vld [vmem:[#allocation8 + $0xc8] sm:$0xff] }
  0x3f   :  { %790 = vmatpush3.bf16.msra.mxu1 %v168_v18  ;;  %v447_v20 = vpack.c.bf16 %v415_v16, %v415_v16  ;;  %v400_v22 = vld [vmem:[#allocation8 + $0x118] sm:$0xff]  ;;  %v381_v37 = vld [vmem:[#allocation8 + $0x80] sm:$0xff]  ;;  %v391_v42 = vld [vmem:[#allocation8 + $0xd0] sm:$0xff] }
  0x40   :  { %791 = vmatprep.subr.bf16.mxu1 %v950_v0  ;;  %v408_v23 = vld [vmem:[#allocation8 + $0x158] sm:$0xff]  ;;  %v418_v56 = vld [vmem:[#allocation8 + $0x1a8] sm:$0x3]  ;;  %v419_v2 = vld [vmem:[#allocation8 + $0x1b0] sm:$0x3] }
  0x41   :  { %800 = vmatpush3.bf16.msra.mxu0 %v238_v35  ;;  %v384_v34 = vld [vmem:[#allocation8 + $0x98] sm:$0xff]  ;;  %v450_v58 = vpack.c.bf16 %v418_v56, %v418_v56  ;;  %v451_v7 = vpack.c.bf16 %v419_v2, %v419_v2  ;;  %v402_v8 = vld [vmem:[#allocation8 + $0x128] sm:$0xff]  ;;  %v409_v16 = vld [vmem:[#allocation8 + $0x160] sm:$0xff] }
  0x42   :  { %801 = vmatprep.subr.bf16.mxu0 %v950_v0  ;;  %v392_v36 = vld [vmem:[#allocation8 + $0xd8] sm:$0xff]  ;;  %v410_v10 = vld [vmem:[#allocation8 + $0x168] sm:$0xff] }
  0x43   :  { %792 = vmatpush3.bf16.msra.mxu1 %v167_v21  ;;  %v432_v39 = vpack.c.bf16 %v392_v36, %v384_v34  ;;  %v752_v61 = vld [vmem:[%s1110_s8] ss:$0 sm:$0xff]  ;;  %v395_v34 = vld [vmem:[#allocation8 + $0xf0] sm:$0xff]  ;;  %v378_v36 = vld [vmem:[#allocation8 + $0x68] sm:$0xff] }
  0x44   :  { %809 = vmatprep.subr.bf16.mxu1 %v950_v0  ;;  %v412_v11 = vld [vmem:[#allocation8 + $0x178] sm:$0xff] }
  0x45   :  { %802 = vmatpush3.bf16.msra.mxu0 %v237_v38  ;;  %v389_v38 = vld [vmem:[#allocation8 + $0xc0] sm:$0xff] }
  0x46   :  { %803 = vmatprep.subr.bf16.mxu0 %v950_v0  ;;  %v429_v40 = vpack.c.bf16 %v389_v38, %v381_v37  ;;  %v372_v37 = vld [vmem:[#allocation8 + $0x38] sm:$0xff] }
  0x47   :  { %v380_v38 = vld [vmem:[#allocation8 + $0x78] sm:$0xff] }
  0x49   :  { %804 = vmatpush3.bf16.msra.mxu0 %v236_v41  ;;  %v383_v41 = vld [vmem:[#allocation8 + $0x90] sm:$0xff] }
  0x4a   :  { %754 = vmatprep.subr.msk.bf16.mxu0 %vm111_vm0, %v446_v4  ;;  %v431_v43 = vpack.c.bf16 %v391_v42, %v383_v41  ;;  %v369_v41 = vld [vmem:[#allocation8 + $0x20] sm:$0xff] }
  0xfb   :  { %v152_v25 = vpop.f32.mrf.mxu0 }
  0xfc   :  { %v153_v29 = vadd.f32 %v746_v26, %v152_v25 }
  0xfd   :  { %v783_v27 = vpop.f32.mrf.mxu0 }
  0xfe   :  { %v505_v27 = vsel %vm111_vm0, %v447_v20, 0 }
  0xff   :  { %v155_v28 = vpop.f32.mrf.mxu0 }
 0x100   :  { %v156_v30 = vadd.f32 %v746_v26, %v155_v28  ;;  %v440_v28 = vpack.c.bf16 %v408_v23, %v400_v22  ;;  %v411_v22 = vld [vmem:[#allocation8 + $0x170] sm:$0xff]  ;;  %v386_v23 = vld [vmem:[#allocation8 + $0xa8] sm:$0xff] }
 0x101   :  { %v784_v31 = vpop.f32.mrf.mxu0 }
 0x102   :  { %v159_v32 = vpack.c.bf16 %v156_v30, %v153_v29  ;;  %v399_v29 = vld [vmem:[#allocation8 + $0x110] sm:$0xff] }
 0x103   :  { %v407_v30 = vld [vmem:[#allocation8 + $0x150] sm:$0xff] }
 0x104   :  { %794 = vmatmul.mubr.msk.bf16.vlgmr.msra.gmra.mxu1 %vm178_vm4, %v159_v32  ;;  %v439_v31 = vpack.c.bf16 %v407_v30, %v399_v29  ;;  %v382_v32 = vld [vmem:[#allocation8 + $0x88] sm:$0xff]  ;;  %v385_v29 = vld [vmem:[#allocation8 + $0xa0] sm:$0xff] }
 0x105   :  { %817 = vmatprep.mubr.msk.bf16.mxu1 %vm951_vm1, %v950_v0  ;;  %810 = vmatpush3.bf16.msra.mxu1 %v319_v44  ;;  %v430_v35 = vpack.c.bf16 %v390_v33, %v382_v32  ;;  %v366_v44 = vld [vmem:[#allocation8 + $0x8] sm:$0xff]  ;;  %v393_v30 = vld [vmem:[#allocation8 + $0xe0] sm:$0xff]  ;;  %v387_v33 = vld [vmem:[#allocation8 + $0xb0] sm:$0xff] }
 0x106   :  { %811 = vmatprep.subr.bf16.mxu1 %v950_v0 }
 0x109   :  { %812 = vmatpush3.bf16.msra.mxu1 %v306_v57  ;;  %v420_v57 = vld [vmem:[#allocation8 + $0x1b8] sm:$0x3] }
 0x10a   :  { %813 = vmatprep.subr.bf16.mxu1 %v950_v0  ;;  %v452_v59 = vpack.c.bf16 %v420_v57, %v420_v57 }
 0x10d   :  { %814 = vmatpush3.bf16.msra.mxu1 %v305_v60  ;;  %v953_v60 = vmov 0  }
 0x10e   :  { %815 = vmatprep.subr.bf16.mxu1 %v950_v0  ;;  %v499_v0 = vsel %vm111_vm0, %v445_v6, 0 }
 0x111   :  { %816 = vmatpush3.bf16.msra.mxu1 %v304_v63  ;;  %v417_v63 = vld [vmem:[#allocation8 + $0x1a0] sm:$0x3] }
 0x112   :  { %756 = vmatprep.subr.msk.bf16.mxu1 %vm111_vm0, %v448_v5  ;;  %v449_v5 = vpack.c.bf16 %v417_v63, %v417_v63 }
 0x1c4   :  { %v219_v46 = vpop.f32.mrf.mxu1 }
 0x1c5   :  { %v220_v48 = vadd.f32 %v748_v45, %v219_v46  ;;  %v368_v46 = vld [vmem:[#allocation8 + $0x18] sm:$0xff] }
 0x1c6   :  { %v795_v47 = vpop.f32.mrf.mxu1 }
 0x1c7   :  { %v226_v52 = vmax.f32 %v220_v48, 0.0  ;;  %v376_v48 = vld [vmem:[#allocation8 + $0x58] sm:$0xff] }
 0x1c8   :  { %v222_v49 = vpop.f32.mrf.mxu1 }
 0x1c9   :  { %v223_v50 = vadd.f32 %v748_v45, %v222_v49  ;;  %v374_v45 = vld [vmem:[#allocation8 + $0x48] sm:$0xff]  ;;  %v365_v49 = vld [vmem:[#allocation8] sm:$0xff] }
 0x1ca   :  { %v796_v51 = vpop.f32.mrf.mxu1  ;;  %v422_v47 = vpack.c.bf16 %v374_v45, %v366_v44  ;;  %v377_v44 = vld [vmem:[#allocation8 + $0x60] sm:$0xff]  ;;  %v371_v45 = vld [vmem:[#allocation8 + $0x30] sm:$0xff] }
 0x1cb   :  { %v227_v53 = vmax.f32 %v223_v50, 0.0  ;;  %v373_v50 = vld [vmem:[#allocation8 + $0x40] sm:$0xff]  ;;  %v424_v51 = vpack.c.bf16 %v376_v48, %v368_v46  ;;  %v379_v46 = vld [vmem:[#allocation8 + $0x70] sm:$0xff] }
 0x1cc   :  { %v427_v48 = vpack.c.bf16 %v379_v46, %v371_v45 }
 0x1cd   :  { %v228_v54 = vpack.c.bf16 %v227_v53, %v226_v52  ;;  %v421_v52 = vpack.c.bf16 %v373_v50, %v365_v49  ;;  %v367_v53 = vld [vmem:[#allocation8 + $0x10] sm:$0xff]  ;;  %v455_v49 = vlaneseq }
 0x1cf   :  { %806 = vmatmul.mubr.msk.bf16.vlgmr.msra.gmra.mxu0 %vm178_vm4, %v228_v54  ;;  %v375_v54 = vld [vmem:[#allocation8 + $0x50] sm:$0xff]  ;;  %v456_v50 = vshrl.u32 %v455_v49, 7 }
 0x1d0   :  { %531 = vmatpush1.bf16.msra.mxu0 %v499_v0  ;;  %v423_v55 = vpack.c.bf16 %v375_v54, %v367_v53  ;;  %554 = vmatprep.mubr.bf16.mxu0 %v953_v60  ;;  %v404_v0 = vld [vmem:[#allocation8 + $0x138] sm:$0xff] }
 0x1d1   :  { %532 = vmatprep.subr.bf16.mxu0 %v438_v9  ;;  %v444_v20 = vpack.c.bf16 %v412_v11, %v404_v0  ;;  %v453_v53 = vld [vmem:[%s1112_s10] sm:$0xff]  ;;  %v461_v54 = vsub.s32 1, %v456_v50  ;;  %s954_s10 = smov [#allocation10]  }
 0x1d2   :  { %s732_s28 = sshll.u32 %s954_s10, 4  ;;  %s733_s28 = int_to_ptr.vmem [resolvable:$true] %s732_s28 }
 0x1d3   :  { %s914_s29 = scalar_lea.vmem %s733_s28, 2048  ;;  %p919_p7 = scmp.lt.s32.totalorder %s733_s28, %s733_s28 }
 0x1d4   :  { %533 = vmatpush1.bf16.msra.mxu0 %v437_v12  ;;  %p915_p6 = scmp.ne.s32.totalorder %s733_s28, %s914_s29  ;;  %p920_p8 = scmp.lt.s32.totalorder %s914_s29, %s914_s29 }
 0x1d5   :  { %534 = vmatprep.subr.bf16.mxu0 %v430_v35  ;;  %v370_v35 = vld [vmem:[#allocation8 + $0x28] sm:$0xff] }
 0x1d6   :  { %v426_v42 = vpack.c.bf16 %v378_v36, %v370_v35  ;;  %p921_p9 = por %p920_p8, %p919_p7 }
 0x1d8   :  { %535 = vmatpush1.bf16.msra.mxu0 %v429_v40  ;;  %v435_v40 = vpack.c.bf16 %v395_v34, %v387_v33  ;;  %p922_p10 = pnand %p921_p9, %p915_p6 }
 0x1d9   :  { %536 = vmatprep.subr.bf16.mxu0 %v422_v47  ;;  %v425_v47 = vpack.c.bf16 %v377_v44, %v369_v41 }
 0x1dc   :  { %537 = vmatpush1.bf16.msra.mxu0 %v421_v52  ;;  %v465_v52 = vsub.s32 2, %v456_v50 }
 0x1dd   :  { %758 = vmatprep.subr.msk.bf16.mxu0 %vm111_vm0, %v450_v58  ;;  %v462_v58 = vrot.slane %v453_v53, %v461_v54 }
 0x1de   :  { %v466_v57 = vrot.slane %v453_v53, %v465_v52 }
 0x28f   :  { %v287_v14 = vpop.f32.mrf.mxu0 }
 0x290   :  { %v288_v17 = vadd.f32 %v750_v13, %v287_v14  ;;  %v511_v14 = vsel %vm111_vm0, %v449_v5, 0 }
 0x291   :  { %v807_v15 = vpop.f32.mrf.mxu0 }
 0x292   :  { %v294_v24 = vmax.f32 %v288_v17, 0.0  ;;  %v401_v15 = vld [vmem:[#allocation8 + $0x120] sm:$0xff] }
 0x293   :  { %v290_v18 = vpop.f32.mrf.mxu0 }
 0x294   :  { %v291_v19 = vadd.f32 %v750_v13, %v290_v18  ;;  %v517_v18 = vsel %vm111_vm0, %v451_v7, 0 }
 0x295   :  { %v808_v21 = vpop.f32.mrf.mxu0 }
 0x296   :  { %v295_v25 = vmax.f32 %v291_v19, 0.0  ;;  %v442_v19 = vpack.c.bf16 %v410_v10, %v402_v8  ;;  %v403_v21 = vld [vmem:[#allocation8 + $0x130] sm:$0xff] }
 0x298   :  { %v296_v26 = vpack.c.bf16 %v295_v25, %v294_v24  ;;  %v394_v24 = vld [vmem:[#allocation8 + $0xe8] sm:$0xff]  ;;  %v388_v25 = vld [vmem:[#allocation8 + $0xb8] sm:$0xff] }
 0x29a   :  { %818 = vmatmul.mubr.msk.bf16.vlgmr.msra.gmra.mxu1 %vm178_vm4, %v296_v26  ;;  %v396_v26 = vld [vmem:[#allocation8 + $0xf8] sm:$0xff] }
 0x29b   :  { %574 = vmatpush1.bf16.msra.mxu1 %v505_v27  ;;  %597 = vmatprep.mubr.bf16.mxu1 %v953_v60  ;;  %v441_v27 = vpack.c.bf16 %v409_v16, %v401_v15  ;;  %v436_v32 = vpack.c.bf16 %v396_v26, %v388_v25 }
 0x29c   :  { %575 = vmatprep.subr.bf16.mxu1 %v440_v28  ;;  %v443_v28 = vpack.c.bf16 %v411_v22, %v403_v21  ;;  %v481_v21 = vsub.s32 6, %v456_v50  ;;  %v477_v22 = vsub.s32 5, %v456_v50 }
 0x29e   :  { %v482_v25 = vrot.slane %v453_v53, %v481_v21  ;;  %v478_v26 = vrot.slane %v453_v53, %v477_v22 }
 0x29f   :  { %576 = vmatpush1.bf16.msra.mxu1 %v439_v31  ;;  %v434_v31 = vpack.c.bf16 %v394_v24, %v386_v23  ;;  %v485_v23 = vsub.s32 7, %v456_v50 }
 0x2a0   :  { %577 = vmatprep.subr.bf16.mxu1 %v432_v39  ;;  %v433_v39 = vpack.c.bf16 %v393_v30, %v385_v29 }
 0x2a3   :  { %578 = vmatpush1.bf16.msra.mxu1 %v431_v43  ;;  %v428_v43 = vpack.c.bf16 %v380_v38, %v372_v37 }
 0x2a4   :  { %579 = vmatprep.subr.bf16.mxu1 %v424_v51  ;;  %v457_v51 = vsub.s32 0, %v456_v50 }
 0x2a6   :  { %v458_v56 = vrot.slane %v453_v53, %v457_v51 }
 0x2a7   :  { %580 = vmatpush1.bf16.msra.mxu1 %v423_v55  ;;  %v469_v55 = vsub.s32 3, %v456_v50 }
 0x2a8   :  { %760 = vmatprep.subr.msk.bf16.mxu1 %vm111_vm0, %v452_v59 }
 0x2a9   :  { %v470_v59 = vrot.slane %v453_v53, %v469_v55 }
 0x35a   :  { %v355_v62 = vpop.f32.mrf.mxu1 }
 0x35b   :  { %v356_v3 = vadd.f32 %v752_v61, %v355_v62 }
 0x35c   :  { %v819_v1 = vpop.f32.mrf.mxu1 }
 0x35d   :  { %v362_v12 = vmax.f32 %v356_v3, 0.0 }
 0x35e   :  { %v358_v4 = vpop.f32.mrf.mxu1 }
 0x35f   :  { %v359_v6 = vadd.f32 %v752_v61, %v358_v4 }
 0x360   :  { %v820_v9 = vpop.f32.mrf.mxu1 }
 0x361   :  { %v363_v13 = vmax.f32 %v359_v6, 0.0 }
 0x363   :  { %v364_v17 = vpack.c.bf16 %v363_v13, %v362_v12 }
 0x365   :  { %755 = vmatmul.mubr.msk.bf16.vlgmr.msra.gmra.mxu0 %vm178_vm4, %v364_v17  ;;  %757 = vmatmul.mubr.msk.bf16.vlgmr.msra.gmra.mxu1 %vm178_vm4, %v364_v17 }
 0x366   :  { %617 = vmatpush1.bf16.msra.mxu0 %v511_v14  ;;  %660 = vmatpush1.bf16.msra.mxu1 %v517_v18 }
 0x367   :  { %618 = vmatprep.subr.bf16.mxu0 %v442_v19  ;;  %661 = vmatprep.subr.bf16.mxu1 %v444_v20  ;;  %v473_v20 = vsub.s32 4, %v456_v50 }
 0x368   :  { %640 = vmatprep.mubr.bf16.mxu0 %v953_v60  ;;  %683 = vmatprep.mubr.bf16.mxu1 %v953_v60 }
 0x369   :  { %v474_v24 = vrot.slane %v453_v53, %v473_v20 }
 0x36a   :  { %619 = vmatpush1.bf16.msra.mxu0 %v441_v27  ;;  %662 = vmatpush1.bf16.msra.mxu1 %v443_v28  ;;  %v486_v27 = vrot.slane %v453_v53, %v485_v23 }
 0x36b   :  { %620 = vmatprep.subr.bf16.mxu0 %v434_v31  ;;  %663 = vmatprep.subr.bf16.mxu1 %v436_v32 }
 0x36e   :  { %621 = vmatpush1.bf16.msra.mxu0 %v433_v39  ;;  %664 = vmatpush1.bf16.msra.mxu1 %v435_v40 }
 0x36f   :  { %622 = vmatprep.subr.bf16.mxu0 %v426_v42  ;;  %665 = vmatprep.subr.bf16.mxu1 %v428_v43 }
 0x372   :  { %623 = vmatpush1.bf16.msra.mxu0 %v425_v47  ;;  %666 = vmatpush1.bf16.msra.mxu1 %v427_v48 }
 0x375   :  { %759 = vmatmul.mubr.msk.bf16.vlgmr.msra.gmra.mxu0 %vm178_vm4, %v364_v17  ;;  %761 = vmatmul.mubr.msk.bf16.vlgmr.msra.gmra.mxu1 %vm178_vm4, %v364_v17 }
 0x425   :  { %v556_v60 = vpop.f32.mrf.mxu0  ;;  %v599_v61 = vpop.f32.mrf.mxu1 }
 0x426   :  { %v557_v62 = vadd.f32 %v556_v60, %v458_v56  ;;  %v600_v63 = vadd.f32 %v599_v61, %v466_v57 }
 0x427   :  { %v558_v1 = vpop.f32.mrf.mxu0  ;;  %v601_v2 = vpop.f32.mrf.mxu1 }
 0x428   :  { %v694_v3 = vmax.f32 %v557_v62, 0.0  ;;  %v696_v4 = vmax.f32 %v600_v63, 0.0  ;;  %v559_v5 = vadd.f32 %v558_v1, %v462_v58  ;;  %v602_v6 = vadd.f32 %v601_v2, %v470_v59 }
 0x429   :  { %v560_v7 = vpop.f32.mrf.mxu0  ;;  %v603_v8 = vpop.f32.mrf.mxu1 }
 0x42a   :  { %710 = vst [vmem:[#allocation10] sm:$0xff] %v694_v3  ;;  %712 = vst [vmem:[#allocation10 + $0x10] sm:$0xff] %v696_v4  ;;  %v695_v9 = vmax.f32 %v559_v5, 0.0  ;;  %v697_v10 = vmax.f32 %v602_v6, 0.0  ;;  %v561_v0 = vadd.f32 %v560_v7, %v458_v56  ;;  %v604_v11 = vadd.f32 %v603_v8, %v466_v57 }
 0x42b   :  { %v562_v12 = vpop.f32.mrf.mxu0  ;;  %v605_v13 = vpop.f32.mrf.mxu1 }
 0x42c   :  { %711 = vst [vmem:[#allocation10 + $0x8] sm:$0xff] %v695_v9  ;;  %713 = vst [vmem:[#allocation10 + $0x18] sm:$0xff] %v697_v10  ;;  %v702_v14 = vmax.f32 %v561_v0, 0.0  ;;  %v704_v15 = vmax.f32 %v604_v11, 0.0  ;;  %v563_v16 = vadd.f32 %v562_v12, %v462_v58  ;;  %v606_v17 = vadd.f32 %v605_v13, %v470_v59 }
 0x42e   :  { %719 = vst [vmem:[#allocation10 + $0x40] sm:$0xff] %v702_v14  ;;  %721 = vst [vmem:[#allocation10 + $0x50] sm:$0xff] %v704_v15  ;;  %v703_v18 = vmax.f32 %v563_v16, 0.0  ;;  %v705_v19 = vmax.f32 %v606_v17, 0.0 }
 0x430   :  { %720 = vst [vmem:[#allocation10 + $0x48] sm:$0xff] %v703_v18  ;;  %722 = vst [vmem:[#allocation10 + $0x58] sm:$0xff] %v705_v19 }
 0x435   :  { %v642_v28 = vpop.f32.mrf.mxu0  ;;  %v685_v29 = vpop.f32.mrf.mxu1 }
 0x436   :  { %v643_v30 = vadd.f32 %v642_v28, %v474_v24  ;;  %v686_v31 = vadd.f32 %v685_v29, %v482_v25 }
 0x437   :  { %v644_v32 = vpop.f32.mrf.mxu0  ;;  %v687_v33 = vpop.f32.mrf.mxu1 }
 0x438   :  { %v698_v34 = vmax.f32 %v643_v30, 0.0  ;;  %v700_v35 = vmax.f32 %v686_v31, 0.0  ;;  %v645_v36 = vadd.f32 %v644_v32, %v478_v26  ;;  %v688_v37 = vadd.f32 %v687_v33, %v486_v27 }
 0x439   :  { %v646_v38 = vpop.f32.mrf.mxu0  ;;  %v689_v39 = vpop.f32.mrf.mxu1 }
 0x43a   :  { %714 = vst [vmem:[#allocation10 + $0x20] sm:$0xff] %v698_v34  ;;  %716 = vst [vmem:[#allocation10 + $0x30] sm:$0xff] %v700_v35  ;;  %v699_v40 = vmax.f32 %v645_v36, 0.0  ;;  %v701_v41 = vmax.f32 %v688_v37, 0.0  ;;  %v647_v42 = vadd.f32 %v646_v38, %v474_v24  ;;  %v690_v43 = vadd.f32 %v689_v39, %v482_v25 }
 0x43b   :  { %v648_v44 = vpop.f32.mrf.mxu0  ;;  %v691_v45 = vpop.f32.mrf.mxu1 }
 0x43c   :  { %715 = vst [vmem:[#allocation10 + $0x28] sm:$0xff] %v699_v40  ;;  %718 = vst.msk [vmem:[#allocation10 + $0x38] sm:$0xff] %vm717_vm5, %v701_v41  ;;  %v706_v46 = vmax.f32 %v647_v42, 0.0  ;;  %v708_v47 = vmax.f32 %v690_v43, 0.0  ;;  %v649_v48 = vadd.f32 %v648_v44, %v478_v26  ;;  %v692_v49 = vadd.f32 %v691_v45, %v486_v27 }
 0x43e   :  { %723 = vst [vmem:[#allocation10 + $0x60] sm:$0xff] %v706_v46  ;;  %725 = vst [vmem:[#allocation10 + $0x70] sm:$0xff] %v708_v47  ;;  %v707_v50 = vmax.f32 %v649_v48, 0.0  ;;  %v709_v51 = vmax.f32 %v692_v49, 0.0 }
 0x440   :  { %724 = vst [vmem:[#allocation10 + $0x68] sm:$0xff] %v707_v50  ;;  %726 = vst.msk [vmem:[#allocation10 + $0x78] sm:$0xff] %vm717_vm5, %v709_v51 }
 0x441   :  { %925 = shalt.err (!%p922_p10)
}
 0x442   :  { %738 = dma.vmem_to_hbm [thread:$0]  %s733_s28, 2048, %s1113_s11, [#allocation4], %s948_s3, %s948_s3, %s949_s17  }
 0x443   :  { %940 = dma.done.wait [#allocation4], 2048  }
 0x444   :  { %941 = vsyncadd [#allocation4], 4294965248 }
 0x445   :  { %742 = vsyncpa [#allocation3], 1 }
 0x446   :  { %743 = vsyncpa [#allocation6], 1 }
 0x447   :  { %744 = vsyncpa [#allocation9], 1 }
 0x448   :  { %745 = vsyncpa [#allocation4], 1 }

</bundles_post_ra>
